<compile_context>
chip_gen: v7x
topology: tpu7x:2x2x1
jax: 0.10.0
libtpu: 0.0.40
codegen_flags: <defaults>
</compile_context>

<pallas_src>
import math

import numpy as np
import jax
import jax.numpy as jnp
from jax import lax
from jax.experimental import pallas as pl
from jax.experimental.pallas import tpu as pltpu

# ----------------------- problem configuration -----------------------
N = 2          # batch
CIN = 4        # in_channel
COUT = 8       # out_channel
K = 4          # kernel
STRIDE = 2
PADDING = 1
DLAT = 16      # dim_latent
H = W = 8      # input spatial
OH = (H - 1) * STRIDE - 2 * PADDING + K   # 16
OW = (W - 1) * STRIDE - 2 * PADDING + K   # 16
EPS = 1e-5     # nn.InstanceNorm2d default eps

A = OH // 2                 # 8   output row-pairs per sample (== H here)
ROWS = N * A                # 16  accumulator rows  (n, a)
KDIM = 3 * (W + 2) * CIN    # 120 contraction: 3 padded-input rows x (W+2) cols x CIN
KP = 128                    # contraction padded to one full 128-lane vreg
JDIM = 2 * OW * COUT        # 256 accumulator lanes (ph, ow, c)  -- lane-dense


# ------------- polyphase / Toeplitz weight gather map (static) -------------
def _make_gather_map():
    """Constant (KP, JDIM) index map into the flattened ConvTranspose2d weight.

    wbig[k, j] = wt_flat_padded[gmap[k, j]], with a zero sentinel for empty taps.
      row  k = dh*(W+2)*CIN + iw*CIN + ci   (padded-input row offset dh, col iw)
      col  j = ph*OW*COUT   + ow*COUT  + c  (output row parity ph, out col ow)
    Derived from: oh = 2a+ph = 2*ih - 1 + kh,  ow = 2*iw_x - 1 + kw (stride 2, pad 1).
    """
    sentinel = CIN * COUT * K * K                         # index of the appended 0.0
    gmap = np.full((KP, JDIM), sentinel, np.int32)
    ci = np.arange(CIN, dtype=np.int32)
    cc = np.arange(COUT, dtype=np.int32)
    # (ph, dh, kh): which padded-input row in the 3-row window feeds which kernel row.
    for ph, dh, kh in ((0, 0, 3), (0, 1, 1), (1, 1, 2), (1, 2, 0)):
        for ow in range(OW):
            b, pw = divmod(ow, 2)
            pairs = ((b, 3), (b + 1, 1)) if pw == 0 else ((b + 1, 2), (b + 2, 0))
            for iw, kw in pairs:
                r0 = dh * (W + 2) * CIN + iw * CIN
                c0 = ph * OW * COUT + ow * COUT
                # wt[ci, c, kh, kw] flattened row-major.
                gmap[r0:r0 + CIN, c0:c0 + COUT] = (ci[:, None] * (COUT * K * K)
                                                   + cc[None, :] * (K * K)
                                                   + kh * K + kw)
    return gmap


def _make_selectors():
    """Constant 0/1 selector matrices (passed as kernel inputs, not built in-kernel)."""
    # (2N, 2*ROWS): stats row-selector over the stacked [acc ; acc*acc].
    rowsel2 = np.zeros((2 * N, 2 * ROWS), np.float32)
    for r in range(2 * N):
        rowsel2[r, r * A:(r + 1) * A] = 1.0
    # (JDIM, COUT): lane j belongs to channel j % COUT (reduction).
    colsel = (np.arange(JDIM)[:, None] % COUT ==
              np.arange(COUT)[None, :]).astype(np.float32)
    colsel_t = np.ascontiguousarray(colsel.T)             # (COUT, JDIM) broadcast
    # (2*ROWS, N): sample selectors -- top half places `scale`, bottom half `shift`.
    rsel_top = np.zeros((2 * ROWS, N), np.float32)
    rsel_bot = np.zeros((2 * ROWS, N), np.float32)
    for i in range(ROWS):
        rsel_top[i, i // A] = 1.0
        rsel_bot[ROWS + i, i // A] = 1.0
    return rowsel2, colsel, colsel_t, rsel_top, rsel_bot


_GMAP = _make_gather_map()
_ROWSEL2, _COLSEL, _COLSEL_T, _RSEL_TOP, _RSEL_BOT = _make_selectors()


# ----------------------------- kernel --------------------------------
def _transconvrelu_kernel(lhs_ref, wbig_ref, lw_ref, wlin_ref, blin_ref,
                          rowsel2_ref, colsel_ref, colsel_t_ref,
                          rsel_top_ref, rsel_bot_ref, o_ref):
    """Single invocation, whole batch.

    lhs_ref    : (ROWS, KP)      f32  lane-dense im2col'd input (zero-padded K dim)
    wbig_ref   : (KP, JDIM)      f32  banded polyphase conv weight
    lw_ref     : (N, DLAT)       f32  latent w
    wlin_ref   : (DLAT, 2*COUT)  f32  pre-scaled style-linear weight (transposed)
    blin_ref   : (1, 2*COUT)     f32  style-linear bias ([ones(C), zeros(C)])
    rowsel2_ref: (2N, 2*ROWS)    f32  selector: per-(n, {sum,sumsq}) row reduction
    colsel_ref : (JDIM, COUT)    f32  selector: lane -> channel reduction
    colsel_t_ref:(COUT, JDIM)    f32  selector: channel -> lane broadcast
    rsel_top_ref:(2*ROWS, N)     f32  selector: place per-sample scale on rows 0..15
    rsel_bot_ref:(2*ROWS, N)     f32  selector: place per-sample shift on rows 16..31
    o_ref      : (ROWS, JDIM)    f32  rows=(n,a), lanes=(ph,ow,c) -- lane-dense
    """
    # Whole-batch transposed conv as ONE MXU matmul, f32 in / f32 accumulate.
    acc = jnp.dot(lhs_ref[...], wbig_ref[...],
                  preferred_element_type=jnp.float32)                       # (16, 256)

    # style = SLinear(latent_w)  (runtime sqrt(2/fan_in) scaling folded into wlin).
    style = jnp.dot(lw_ref[...], wlin_ref[...],
                    preferred_element_type=jnp.float32) + blin_ref[...]     # (N, 16)
    factor = style[:, :COUT]                                                # (N, 8)
    sbias = style[:, COUT:]                                                 # (N, 8)

    # InstanceNorm2d stats: 2 selector matmuls on the sublane-stacked (aligned)
    # [acc ; acc*acc] -- acc is never reshaped/relayouted.
    stacked = jnp.concatenate([acc, acc * acc], axis=0)                     # (32, 256)
    stats = jnp.dot(
        jnp.dot(rowsel2_ref[...], stacked, preferred_element_type=jnp.float32),
        colsel_ref[...], preferred_element_type=jnp.float32)                # (4, 8)
    inv_cnt = 1.0 / float(OH * OW)
    mean = stats[:N] * inv_cnt                                              # (N, 8)
    # Clamp E[x^2]-mean^2 cancellation (can go slightly negative in f32).
    var = jnp.maximum(stats[N:] * inv_cnt - mean * mean, 0.0)
    rstd = lax.rsqrt(var + EPS)

    # Fused AdaIN affine.  The ConvTranspose2d bias is omitted on purpose: a
    # per-channel constant is exactly cancelled by the mean subtraction.
    scale = factor * rstd                                                   # (N, 8)
    shift = sbias - mean * scale                                            # (N, 8)

    # Row-wise placement (scale on rows 0..15, shift on rows 16..31), then one
    # channel->lane broadcast matmul: 3 tiny matmuls total, no in-kernel relayout.
    inter = (jnp.dot(rsel_top_ref[...], scale, preferred_element_type=jnp.float32) +
             jnp.dot(rsel_bot_ref[...], shift, preferred_element_type=jnp.float32))  # (32, 8)
    full = jnp.dot(inter, colsel_t_ref[...],
                   preferred_element_type=jnp.float32)                      # (32, 256)

    # Single fused scale/shift + ReLU; unmasked lane-dense (256-wide) store.
    o_ref[...] = jnp.maximum(acc * full[:ROWS] + full[ROWS:], 0.0).astype(o_ref.dtype)


# ----------------------------- wrappers --------------------------------
def prepare_params(wt, bconv, wlin, blin):
    """Per-weight precomputation: run ONCE per weight update, NOT per forward call."""
    del bconv  # per-channel constant shift is removed by the InstanceNorm mean subtraction
    # Banded polyphase conv weight via a GATHER from a constant index map (no scatter).
    wt_flat = jnp.concatenate([jnp.asarray(wt, jnp.float32).reshape(-1),
                               jnp.zeros((1,), jnp.float32)])
    wbig = wt_flat[_GMAP]                                    # (KP, JDIM) f32
    # SLinear runtime scaling (ScaleW hook) folded into the weight.
    wlin_t = (jnp.asarray(wlin, jnp.float32) * math.sqrt(2.0 / DLAT)).T     # (DLAT, 2C)
    blin2 = jnp.asarray(blin, jnp.float32).reshape(1, 2 * COUT)
    return wbig, wlin_t, blin2


@jax.jit
def transconvrelu_forward(x_nhwc, latent_w, wbig, wlin_t, blin2):
    """Forward pass of transconvrelu.

    x_nhwc  : (N, H, W, CIN) float32 (channels-last)
    latent_w: (N, DLAT)      float32
    wbig/wlin_t/blin2 : outputs of prepare_params (precomputed once per weight update)
    returns : (N, OH, OW, COUT) float32 (NHWC)
    """
    # im2col in the wrapper: 1-pixel zero pad + height window (size 3, stride 1);
    # the width conv + 2x2 output-parity interleave live inside wbig, so no
    # zero-dilated tensor is ever built and the kernel does no lane-axis concat.
    xpad = jnp.pad(x_nhwc, ((0, 0), (1, 1), (1, 1), (0, 0)))
    xpr = xpad.reshape(N, H + 2, (W + 2) * CIN)                             # (2, 10, 40)
    lhs = jnp.concatenate([xpr[:, 0:A, :], xpr[:, 1:A + 1, :], xpr[:, 2:A + 2, :]],
                          axis=2).reshape(ROWS, KDIM)                       # (16, 120)
    lhs = jnp.pad(lhs, ((0, 0), (0, KP - KDIM)))                            # (16, 128)

    grid_spec = pltpu.PrefetchScalarGridSpec(
        num_scalar_prefetch=0,
        grid=(1,),                                       # whole batch in one step
        in_specs=[
            pl.BlockSpec((ROWS, KP), lambda i: (0, 0)),
            pl.BlockSpec((KP, JDIM), lambda i: (0, 0)),
            pl.BlockSpec((N, DLAT), lambda i: (0, 0)),
            pl.BlockSpec((DLAT, 2 * COUT), lambda i: (0, 0)),
            pl.BlockSpec((1, 2 * COUT), lambda i: (0, 0)),
            pl.BlockSpec((2 * N, 2 * ROWS), lambda i: (0, 0)),
            pl.BlockSpec((JDIM, COUT), lambda i: (0, 0)),
            pl.BlockSpec((COUT, JDIM), lambda i: (0, 0)),
            pl.BlockSpec((2 * ROWS, N), lambda i: (0, 0)),
            pl.BlockSpec((2 * ROWS, N), lambda i: (0, 0)),
        ],
        out_specs=pl.BlockSpec((ROWS, JDIM), lambda i: (0, 0)),
    )

    raw = pl.pallas_call(
        _transconvrelu_kernel,
        out_shape=jax.ShapeDtypeStruct((ROWS, JDIM), jnp.float32),
        grid_spec=grid_spec,
        compiler_params=pltpu.CompilerParams(
            dimension_semantics=("arbitrary",)),         # don't shard a 1-step grid
    )(lhs, wbig, latent_w, wlin_t, blin2,
      jnp.asarray(_ROWSEL2), jnp.asarray(_COLSEL), jnp.asarray(_COLSEL_T),
      jnp.asarray(_RSEL_TOP), jnp.asarray(_RSEL_BOT))

    # (ROWS, JDIM) rows=(n,a), lanes=(ph,ow,c)  ->  NHWC, a pure (free) reshape.
    return raw.reshape(N, OH, OW, COUT)


# --------------------------- numpy reference ---------------------------
def _reference_nchw(x_nchw, lw, wt, bconv, wlin, blin):
    x_nchw = np.asarray(x_nchw); lw = np.asarray(lw)
    wt = np.asarray(wt); bconv = np.asarray(bconv)
    wlin = np.asarray(wlin); blin = np.asarray(blin)

    y = np.zeros((N, COUT, OH, OW), np.float32)
    for n in range(N):
        for ci in range(CIN):
            for ih in range(H):
                for iw in range(W):
                    oh0 = ih * STRIDE - PADDING
                    ow0 = iw * STRIDE - PADDING
                    for kh in range(K):
                        oh = oh0 + kh
                        if oh < 0 or oh >= OH:
                            continue
                        for kw in range(K):
                            ow = ow0 + kw
                            if ow < 0 or ow >= OW:
                                continue
                            y[n, :, oh, ow] += x_nchw[n, ci, ih, iw] * wt[ci, :, kh, kw]
    y += bconv[None, :, None, None]   # kept in the reference; cancels under InstanceNorm

    style = lw @ (wlin * math.sqrt(2.0 / DLAT)).T + blin          # (N, 2C)
    factor = style[:, :COUT][:, :, None, None]
    sbias = style[:, COUT:][:, :, None, None]

    mean = y.mean(axis=(2, 3), keepdims=True)
    var = y.var(axis=(2, 3), keepdims=True)                       # biased
    out = (y - mean) / np.sqrt(var + EPS) * factor + sbias
    return np.maximum(out, 0.0)


# ------------------------------- main ----------------------------------
if __name__ == "__main__":
    key = jax.random.PRNGKey(0)
    k1, k2, k3, k4, k5 = jax.random.split(key, 5)

    # parameters (deterministic, synthetic)
    wt = jax.random.normal(k1, (CIN, COUT, K, K), jnp.float32) * 0.1   # ConvTranspose2d weight
    bconv = jax.random.normal(k2, (COUT,), jnp.float32) * 0.1          # ConvTranspose2d bias
    wlin = jax.random.normal(k3, (2 * COUT, DLAT), jnp.float32)        # SLinear weight ~ N(0,1)
    blin = jnp.concatenate([jnp.ones((COUT,), jnp.float32),            # FC_A bias init
                            jnp.zeros((COUT,), jnp.float32)])

    # inputs
    x_nchw = jax.random.normal(k4, (N, CIN, H, W), jnp.float32)        # PyTorch layout
    latent_w = jax.random.normal(k5, (N, DLAT), jnp.float32)

    x_nhwc = jnp.transpose(x_nchw, (0, 2, 3, 1))

    # One-time parameter preparation (outside the per-call hot path).
    wbig, wlin_t, blin2 = prepare_params(wt, bconv, wlin, blin)

    out_nhwc = transconvrelu_forward(x_nhwc, latent_w, wbig, wlin_t, blin2)
    out_nhwc = jax.block_until_ready(out_nhwc)

    # correctness check against a direct NCHW numpy reference
    ref_nchw = _reference_nchw(x_nchw, latent_w, wt, bconv, wlin, blin)
    got_nchw = np.transpose(np.asarray(out_nhwc), (0, 3, 1, 2))
    np.testing.assert_allclose(got_nchw, ref_nchw, rtol=5e-2, atol=5e-2)

    print("KERNEL_OK")
</pallas_src>

<mosaic_0001>
module attributes {stable_mosaic.version = 11 : i64} {
  func.func @_transconvrelu_kernel(%arg0: i32, %arg1: memref<16x128xf32, #tpu.memory_space<vmem>>, %arg2: memref<128x256xf32, #tpu.memory_space<vmem>>, %arg3: memref<2x16xf32, #tpu.memory_space<vmem>>, %arg4: memref<16x16xf32, #tpu.memory_space<vmem>>, %arg5: memref<1x16xf32, #tpu.memory_space<vmem>>, %arg6: memref<4x32xf32, #tpu.memory_space<vmem>>, %arg7: memref<256x8xf32, #tpu.memory_space<vmem>>, %arg8: memref<8x256xf32, #tpu.memory_space<vmem>>, %arg9: memref<32x2xf32, #tpu.memory_space<vmem>>, %arg10: memref<32x2xf32, #tpu.memory_space<vmem>>, %arg11: memref<16x256xf32, #tpu.memory_space<vmem>>) attributes {dimension_semantics = [#tpu.dimension_semantics<arbitrary>], iteration_bounds = array<i64: 1>, scalar_prefetch = 0 : i64, scratch_operands = 0 : i64, tpu.core_type = #tpu.core_type<tc>, window_params = [{pipeline_mode = #tpu.pipeline_mode<synchronous>, transform_indices = @transform_0, window_bounds = array<i64: 16, 128>}, {pipeline_mode = #tpu.pipeline_mode<synchronous>, transform_indices = @transform_1, window_bounds = array<i64: 128, 256>}, {pipeline_mode = #tpu.pipeline_mode<synchronous>, transform_indices = @transform_2, window_bounds = array<i64: 2, 16>}, {pipeline_mode = #tpu.pipeline_mode<synchronous>, transform_indices = @transform_3, window_bounds = array<i64: 16, 16>}, {pipeline_mode = #tpu.pipeline_mode<synchronous>, transform_indices = @transform_4, window_bounds = array<i64: 1, 16>}, {pipeline_mode = #tpu.pipeline_mode<synchronous>, transform_indices = @transform_5, window_bounds = array<i64: 4, 32>}, {pipeline_mode = #tpu.pipeline_mode<synchronous>, transform_indices = @transform_6, window_bounds = array<i64: 256, 8>}, {pipeline_mode = #tpu.pipeline_mode<synchronous>, transform_indices = @transform_7, window_bounds = array<i64: 8, 256>}, {pipeline_mode = #tpu.pipeline_mode<synchronous>, transform_indices = @transform_8, window_bounds = array<i64: 32, 2>}, {pipeline_mode = #tpu.pipeline_mode<synchronous>, transform_indices = @transform_9, window_bounds = array<i64: 32, 2>}, {pipeline_mode = #tpu.pipeline_mode<synchronous>, transform_indices = @transform_10, window_bounds = array<i64: 16, 256>}]} {
    %c0 = arith.constant 0 : index
    %c0_0 = arith.constant 0 : index
    %0 = vector.load %arg1[%c0, %c0_0] : memref<16x128xf32, #tpu.memory_space<vmem>>, vector<16x128xf32>
    %c0_1 = arith.constant 0 : index
    %c0_2 = arith.constant 0 : index
    %1 = vector.load %arg2[%c0_1, %c0_2] : memref<128x256xf32, #tpu.memory_space<vmem>>, vector<128x256xf32>
    %cst = arith.constant dense<0.000000e+00> : vector<16x256xf32>
    %2 = tpu.matmul %0, %1, %cst {dimension_numbers = #tpu.dot_dimension_numbers<[1], [0], [0], [1], [0, 0, 1, 1], [], []>} : vector<16x128xf32>, vector<128x256xf32>, vector<16x256xf32> -> vector<16x256xf32>
    %c0_3 = arith.constant 0 : index
    %c0_4 = arith.constant 0 : index
    %3 = vector.load %arg3[%c0_3, %c0_4] : memref<2x16xf32, #tpu.memory_space<vmem>>, vector<2x16xf32>
    %c0_5 = arith.constant 0 : index
    %c0_6 = arith.constant 0 : index
    %4 = vector.load %arg4[%c0_5, %c0_6] : memref<16x16xf32, #tpu.memory_space<vmem>>, vector<16x16xf32>
    %cst_7 = arith.constant dense<0.000000e+00> : vector<2x16xf32>
    %5 = tpu.matmul %3, %4, %cst_7 {dimension_numbers = #tpu.dot_dimension_numbers<[1], [0], [0], [1], [0, 0, 1, 1], [], []>} : vector<2x16xf32>, vector<16x16xf32>, vector<2x16xf32> -> vector<2x16xf32>
    %c0_8 = arith.constant 0 : index
    %c0_9 = arith.constant 0 : index
    %6 = vector.load %arg5[%c0_8, %c0_9] : memref<1x16xf32, #tpu.memory_space<vmem>>, vector<1x16xf32>
    %7 = vector.broadcast %6 : vector<1x16xf32> to vector<2x16xf32>
    %8 = arith.addf %5, %7 : vector<2x16xf32>
    %9 = vector.extract_strided_slice %8 {offsets = [0, 0], sizes = [2, 8], strides = [1, 1]} : vector<2x16xf32> to vector<2x8xf32>
    %10 = vector.extract_strided_slice %8 {offsets = [0, 8], sizes = [2, 8], strides = [1, 1]} : vector<2x16xf32> to vector<2x8xf32>
    %11 = arith.mulf %2, %2 : vector<16x256xf32>
    %12 = tpu.concatenate %2, %11 in 0 : vector<16x256xf32>, vector<16x256xf32> -> vector<32x256xf32>
    %c0_10 = arith.constant 0 : index
    %c0_11 = arith.constant 0 : index
    %13 = vector.load %arg6[%c0_10, %c0_11] : memref<4x32xf32, #tpu.memory_space<vmem>>, vector<4x32xf32>
    %cst_12 = arith.constant dense<0.000000e+00> : vector<4x256xf32>
    %14 = tpu.matmul %13, %12, %cst_12 {dimension_numbers = #tpu.dot_dimension_numbers<[1], [0], [0], [1], [0, 0, 1, 1], [], []>} : vector<4x32xf32>, vector<32x256xf32>, vector<4x256xf32> -> vector<4x256xf32>
    %c0_13 = arith.constant 0 : index
    %c0_14 = arith.constant 0 : index
    %15 = vector.load %arg7[%c0_13, %c0_14] : memref<256x8xf32, #tpu.memory_space<vmem>>, vector<256x8xf32>
    %cst_15 = arith.constant dense<0.000000e+00> : vector<4x8xf32>
    %16 = tpu.matmul %14, %15, %cst_15 {dimension_numbers = #tpu.dot_dimension_numbers<[1], [0], [0], [1], [0, 0, 1, 1], [], []>} : vector<4x256xf32>, vector<256x8xf32>, vector<4x8xf32> -> vector<4x8xf32>
    %17 = vector.extract_strided_slice %16 {offsets = [0, 0], sizes = [2, 8], strides = [1, 1]} : vector<4x8xf32> to vector<2x8xf32>
    %cst_16 = arith.constant 3.906250e-03 : f32
    %18 = vector.broadcast %cst_16 : f32 to vector<2x8xf32>
    %19 = arith.mulf %17, %18 : vector<2x8xf32>
    %20 = vector.extract_strided_slice %16 {offsets = [2, 0], sizes = [2, 8], strides = [1, 1]} : vector<4x8xf32> to vector<2x8xf32>
    %cst_17 = arith.constant 3.906250e-03 : f32
    %21 = vector.broadcast %cst_17 : f32 to vector<2x8xf32>
    %22 = arith.mulf %20, %21 : vector<2x8xf32>
    %23 = arith.mulf %19, %19 : vector<2x8xf32>
    %24 = arith.subf %22, %23 : vector<2x8xf32>
    %cst_18 = arith.constant 0.000000e+00 : f32
    %25 = vector.broadcast %cst_18 : f32 to vector<2x8xf32>
    %26 = arith.maximumf %24, %25 : vector<2x8xf32>
    %cst_19 = arith.constant 9.99999974E-6 : f32
    %27 = vector.broadcast %cst_19 : f32 to vector<2x8xf32>
    %28 = arith.addf %26, %27 : vector<2x8xf32>
    %29 = math.rsqrt %28 : vector<2x8xf32>
    %30 = arith.mulf %9, %29 : vector<2x8xf32>
    %31 = arith.mulf %19, %30 : vector<2x8xf32>
    %32 = arith.subf %10, %31 : vector<2x8xf32>
    %c0_20 = arith.constant 0 : index
    %c0_21 = arith.constant 0 : index
    %33 = vector.load %arg9[%c0_20, %c0_21] : memref<32x2xf32, #tpu.memory_space<vmem>>, vector<32x2xf32>
    %cst_22 = arith.constant dense<0.000000e+00> : vector<32x8xf32>
    %34 = tpu.matmul %33, %30, %cst_22 {dimension_numbers = #tpu.dot_dimension_numbers<[1], [0], [0], [1], [0, 0, 1, 1], [], []>} : vector<32x2xf32>, vector<2x8xf32>, vector<32x8xf32> -> vector<32x8xf32>
    %c0_23 = arith.constant 0 : index
    %c0_24 = arith.constant 0 : index
    %35 = vector.load %arg10[%c0_23, %c0_24] : memref<32x2xf32, #tpu.memory_space<vmem>>, vector<32x2xf32>
    %cst_25 = arith.constant dense<0.000000e+00> : vector<32x8xf32>
    %36 = tpu.matmul %35, %32, %cst_25 {dimension_numbers = #tpu.dot_dimension_numbers<[1], [0], [0], [1], [0, 0, 1, 1], [], []>} : vector<32x2xf32>, vector<2x8xf32>, vector<32x8xf32> -> vector<32x8xf32>
    %37 = arith.addf %34, %36 : vector<32x8xf32>
    %c0_26 = arith.constant 0 : index
    %c0_27 = arith.constant 0 : index
    %38 = vector.load %arg8[%c0_26, %c0_27] : memref<8x256xf32, #tpu.memory_space<vmem>>, vector<8x256xf32>
    %cst_28 = arith.constant dense<0.000000e+00> : vector<32x256xf32>
    %39 = tpu.matmul %37, %38, %cst_28 {dimension_numbers = #tpu.dot_dimension_numbers<[1], [0], [0], [1], [0, 0, 1, 1], [], []>} : vector<32x8xf32>, vector<8x256xf32>, vector<32x256xf32> -> vector<32x256xf32>
    %40 = vector.extract_strided_slice %39 {offsets = [0, 0], sizes = [16, 256], strides = [1, 1]} : vector<32x256xf32> to vector<16x256xf32>
    %41 = arith.mulf %2, %40 : vector<16x256xf32>
    %42 = vector.extract_strided_slice %39 {offsets = [16, 0], sizes = [16, 256], strides = [1, 1]} : vector<32x256xf32> to vector<16x256xf32>
    %43 = arith.addf %41, %42 : vector<16x256xf32>
    %cst_29 = arith.constant 0.000000e+00 : f32
    %44 = vector.broadcast %cst_29 : f32 to vector<16x256xf32>
    %45 = arith.maximumf %43, %44 : vector<16x256xf32>
    %c0_30 = arith.constant 0 : index
    %c0_31 = arith.constant 0 : index
    %46 = vector.load %arg11[%c0_30, %c0_31] : memref<16x256xf32, #tpu.memory_space<vmem>>, vector<16x256xf32>
    tpu.vector_store %arg11[%c0_30, %c0_31], %45 {strides = array<i32>} : memref<16x256xf32, #tpu.memory_space<vmem>>, vector<16x256xf32>,
    return
  }
  func.func @transform_0(%arg0: i32) -> (i32, i32) {
    %c0_i32 = arith.constant 0 : i32
    %c0_i32_0 = arith.constant 0 : i32
    %c0_i32_1 = arith.constant 0 : i32
    return %c0_i32, %c0_i32_0 : i32, i32
  }
  func.func @transform_1(%arg0: i32) -> (i32, i32) {
    %c0_i32 = arith.constant 0 : i32
    %c0_i32_0 = arith.constant 0 : i32
    %c0_i32_1 = arith.constant 0 : i32
    return %c0_i32, %c0_i32_0 : i32, i32
  }
  func.func @transform_2(%arg0: i32) -> (i32, i32) {
    %c0_i32 = arith.constant 0 : i32
    %c0_i32_0 = arith.constant 0 : i32
    %c0_i32_1 = arith.constant 0 : i32
    return %c0_i32, %c0_i32_0 : i32, i32
  }
  func.func @transform_3(%arg0: i32) -> (i32, i32) {
    %c0_i32 = arith.constant 0 : i32
    %c0_i32_0 = arith.constant 0 : i32
    %c0_i32_1 = arith.constant 0 : i32
    return %c0_i32, %c0_i32_0 : i32, i32
  }
  func.func @transform_4(%arg0: i32) -> (i32, i32) {
    %c0_i32 = arith.constant 0 : i32
    %c0_i32_0 = arith.constant 0 : i32
    %c0_i32_1 = arith.constant 0 : i32
    return %c0_i32, %c0_i32_0 : i32, i32
  }
  func.func @transform_5(%arg0: i32) -> (i32, i32) {
    %c0_i32 = arith.constant 0 : i32
    %c0_i32_0 = arith.constant 0 : i32
    %c0_i32_1 = arith.constant 0 : i32
    return %c0_i32, %c0_i32_0 : i32, i32
  }
  func.func @transform_6(%arg0: i32) -> (i32, i32) {
    %c0_i32 = arith.constant 0 : i32
    %c0_i32_0 = arith.constant 0 : i32
    %c0_i32_1 = arith.constant 0 : i32
    return %c0_i32, %c0_i32_0 : i32, i32
  }
  func.func @transform_7(%arg0: i32) -> (i32, i32) {
    %c0_i32 = arith.constant 0 : i32
    %c0_i32_0 = arith.constant 0 : i32
    %c0_i32_1 = arith.constant 0 : i32
    return %c0_i32, %c0_i32_0 : i32, i32
  }
  func.func @transform_8(%arg0: i32) -> (i32, i32) {
    %c0_i32 = arith.constant 0 : i32
    %c0_i32_0 = arith.constant 0 : i32
    %c0_i32_1 = arith.constant 0 : i32
    return %c0_i32, %c0_i32_0 : i32, i32
  }
  func.func @transform_9(%arg0: i32) -> (i32, i32) {
    %c0_i32 = arith.constant 0 : i32
    %c0_i32_0 = arith.constant 0 : i32
    %c0_i32_1 = arith.constant 0 : i32
    return %c0_i32, %c0_i32_0 : i32, i32
  }
  func.func @transform_10(%arg0: i32) -> (i32, i32) {
    %c0_i32 = arith.constant 0 : i32
    %c0_i32_0 = arith.constant 0 : i32
    %c0_i32_1 = arith.constant 0 : i32
    return %c0_i32, %c0_i32_0 : i32, i32
  }
}

</mosaic_0001>

<bundles_post_ra>
// kernel: transconvrelu_forward.1
= control target key start
LH: loop header
LB: loop body
LE: loop exit
PB: predicated region body
PF: predicated region fallthrough
CT: control target
= control target key end

     0   :  { %v941_v3 = vmov 0.0   ;;  %vm235_vm0 = vcmask 261120   ;;  %vm943_vm1 = vmmov 0   ;;  %vm156_vm2 = vcmask 130048   ;;  %s945_s24 = smov 120   ;;  %s1296_s1 = inlined_call_operand.vmem [shape: f32[128,256], index: 1, kind: input, shape index: {}]   ;;  %s1297_s0 = inlined_call_operand.vmem [shape: f32[16,128], index: 0, kind: input, shape index: {}]   ;;  %s1298_s6 = inlined_call_operand.vmem [shape: f32[256,8], index: 6, kind: input, shape index: {}]   ;;  %s1299_s5 = inlined_call_operand.vmem [shape: f32[4,32], index: 5, kind: input, shape index: {}]   ;;  %s1300_s3 = inlined_call_operand.vmem [shape: f32[16,16], index: 3, kind: input, shape index: {}]   ;;  %s1301_s2 = inlined_call_operand.vmem [shape: f32[2,16], index: 2, kind: input, shape index: {}]   ;;  %s1302_s4 = inlined_call_operand.vmem [shape: f32[1,16], index: 4, kind: input, shape index: {}]   ;;  %s1303_s9 = inlined_call_operand.vmem [shape: f32[32,2], index: 9, kind: input, shape index: {}]   ;;  %s1304_s8 = inlined_call_operand.vmem [shape: f32[32,2], index: 8, kind: input, shape index: {}]   ;;  %s1305_s7 = inlined_call_operand.vmem [shape: f32[8,256], index: 7, kind: input, shape index: {}]   ;;  %s1306_s10 = inlined_call_operand.vmem [shape: f32[16,256], index: 10, kind: output, shape index: {}]  }
   0x1   :  { %v38_v0 = vld [vmem:[%s1296_s1 + $0x8] sm:$0xff]  ;;  %v40_v1 = vld [vmem:[%s1296_s1 + $0x18] sm:$0xff]  ;;  %v37_v2 = vld [vmem:[%s1296_s1] sm:$0xff]  ;;  %133 = vmatprep.mubr.f32.mxu0 %v941_v3  ;;  %303 = vmatprep.mubr.f32.mxu1 %v941_v3  ;;  %vm442_vm3 = vcmask 15360   ;;  %vm455_vm4 = vcmask 1041408   ;;  %vm645_vm5 = vcmask 64512  }
   0x2   :  { %v855_v4 = vpack.c.bf16 %v40_v1, %v38_v0  ;;  %v39_v5 = vld [vmem:[%s1296_s1 + $0x10] sm:$0xff]  ;;  %v42_v6 = vld [vmem:[%s1296_s1 + $0x28] sm:$0xff]  ;;  %v44_v7 = vld [vmem:[%s1296_s1 + $0x38] sm:$0xff] }
   0x3   :  { %v857_v8 = vpack.c.bf16 %v39_v5, %v37_v2  ;;  %v859_v9 = vpack.c.bf16 %v44_v7, %v42_v6  ;;  %v41_v10 = vld [vmem:[%s1296_s1 + $0x20] sm:$0xff]  ;;  %v43_v11 = vld [vmem:[%s1296_s1 + $0x30] sm:$0xff]  ;;  %v46_v12 = vld [vmem:[%s1296_s1 + $0x48] sm:$0xff] }
   0x4   :  { %856 = vmatprep.subr.bf16.mxu0 %v855_v4  ;;  %v48_v13 = vld [vmem:[%s1296_s1 + $0x58] sm:$0xff]  ;;  %v861_v14 = vpack.c.bf16 %v43_v11, %v41_v10  ;;  %v45_v16 = vld [vmem:[%s1296_s1 + $0x40] sm:$0xff]  ;;  %v47_v17 = vld [vmem:[%s1296_s1 + $0x50] sm:$0xff] }
   0x5   :  { %858 = vmatpush1.bf16.msra.mxu0 %v857_v8  ;;  %v863_v15 = vpack.c.bf16 %v48_v13, %v46_v12  ;;  %v50_v18 = vld [vmem:[%s1296_s1 + $0x68] sm:$0xff]  ;;  %v52_v19 = vld [vmem:[%s1296_s1 + $0x78] sm:$0xff]  ;;  %v865_v20 = vpack.c.bf16 %v47_v17, %v45_v16  ;;  %v49_v22 = vld [vmem:[%s1296_s1 + $0x60] sm:$0xff] }
   0x6   :  { %860 = vmatprep.subr.bf16.mxu0 %v859_v9  ;;  %v867_v21 = vpack.c.bf16 %v52_v19, %v50_v18  ;;  %v51_v23 = vld [vmem:[%s1296_s1 + $0x70] sm:$0xff]  ;;  %v54_v24 = vld [vmem:[%s1296_s1 + $0x88] sm:$0xff]  ;;  %v56_v25 = vld [vmem:[%s1296_s1 + $0x98] sm:$0xff] }
   0x7   :  { %v869_v26 = vpack.c.bf16 %v51_v23, %v49_v22  ;;  %v871_v27 = vpack.c.bf16 %v56_v25, %v54_v24  ;;  %v53_v28 = vld [vmem:[%s1296_s1 + $0x80] sm:$0xff]  ;;  %v55_v29 = vld [vmem:[%s1296_s1 + $0x90] sm:$0xff]  ;;  %v58_v30 = vld [vmem:[%s1296_s1 + $0xa8] sm:$0xff] }
   0x8   :  { %v60_v31 = vld [vmem:[%s1296_s1 + $0xb8] sm:$0xff]  ;;  %v873_v32 = vpack.c.bf16 %v55_v29, %v53_v28  ;;  %v57_v34 = vld [vmem:[%s1296_s1 + $0xa0] sm:$0xff]  ;;  %v59_v35 = vld [vmem:[%s1296_s1 + $0xb0] sm:$0xff] }
   0x9   :  { %862 = vmatpush1.bf16.msra.mxu0 %v861_v14  ;;  %v875_v33 = vpack.c.bf16 %v60_v31, %v58_v30  ;;  %v62_v36 = vld [vmem:[%s1296_s1 + $0xc8] sm:$0xff]  ;;  %v64_v37 = vld [vmem:[%s1296_s1 + $0xd8] sm:$0xff]  ;;  %v877_v38 = vpack.c.bf16 %v59_v35, %v57_v34  ;;  %v61_v40 = vld [vmem:[%s1296_s1 + $0xc0] sm:$0xff] }
   0xa   :  { %864 = vmatprep.subr.bf16.mxu0 %v863_v15  ;;  %v879_v39 = vpack.c.bf16 %v64_v37, %v62_v36  ;;  %v63_v41 = vld [vmem:[%s1296_s1 + $0xd0] sm:$0xff]  ;;  %v66_v42 = vld [vmem:[%s1296_s1 + $0xe8] sm:$0xff]  ;;  %v68_v43 = vld [vmem:[%s1296_s1 + $0xf8] sm:$0xff] }
   0xb   :  { %v881_v44 = vpack.c.bf16 %v63_v41, %v61_v40  ;;  %v883_v45 = vpack.c.bf16 %v68_v43, %v66_v42  ;;  %v65_v46 = vld [vmem:[%s1296_s1 + $0xe0] sm:$0xff]  ;;  %v67_v47 = vld [vmem:[%s1296_s1 + $0xf0] sm:$0xff]  ;;  %v36_v50 = vld [vmem:[%s1297_s0 + $0x8] sm:$0xff] }
   0xc   :  { %v885_v48 = vpack.c.bf16 %v67_v47, %v65_v46  ;;  %v35_v49 = vld [vmem:[%s1297_s0] sm:$0xff]  ;;  %v327_v63 = vld [vmem:[%s1298_s6 + $0x88] sm:$0xff]  ;;  %v328_v5 = vld [vmem:[%s1298_s6 + $0x90] sm:$0xff] }
   0xd   :  { %866 = vmatpush1.bf16.msra.mxu0 %v865_v20  ;;  %v326_v62 = vld [vmem:[%s1298_s6 + $0x80] sm:$0xff]  ;;  %v311_v4 = vld [vmem:[%s1298_s6 + $0x8] sm:$0xff]  ;;  %v329_v6 = vld [vmem:[%s1298_s6 + $0x98] sm:$0xff] }
   0xe   :  { %868 = vmatprep.subr.bf16.mxu0 %v867_v21  ;;  %v898_v1 = vpack.c.bf16 %v327_v63, %v326_v62  ;;  %v310_v2 = vld [vmem:[%s1298_s6] sm:$0xff]  ;;  %v902_v9 = vpack.c.bf16 %v329_v6, %v328_v5  ;;  %v312_v10 = vld [vmem:[%s1298_s6 + $0x10] sm:$0xff]  ;;  %v313_v11 = vld [vmem:[%s1298_s6 + $0x18] sm:$0xff] }
   0xf   :  { %v234_v7 = vld [vmem:[%s1299_s5] sm:$0xf]  ;;  %v900_v8 = vpack.c.bf16 %v311_v4, %v310_v2  ;;  %v331_v13 = vld [vmem:[%s1298_s6 + $0xa8] sm:$0xff]  ;;  %v904_v14 = vpack.c.bf16 %v313_v11, %v312_v10  ;;  %v332_v18 = vld [vmem:[%s1298_s6 + $0xb0] sm:$0xff] }
  0x10   :  { %v330_v12 = vld [vmem:[%s1298_s6 + $0xa0] sm:$0xff]  ;;  %v315_v17 = vld [vmem:[%s1298_s6 + $0x28] sm:$0xff]  ;;  %v333_v19 = vld [vmem:[%s1298_s6 + $0xb8] sm:$0xff] }
  0x11   :  { %870 = vmatpush1.bf16.msra.mxu0 %v869_v26  ;;  %v906_v15 = vpack.c.bf16 %v331_v13, %v330_v12  ;;  %v314_v16 = vld [vmem:[%s1298_s6 + $0x20] sm:$0xff]  ;;  %v910_v21 = vpack.c.bf16 %v333_v19, %v332_v18  ;;  %v316_v22 = vld [vmem:[%s1298_s6 + $0x30] sm:$0xff]  ;;  %v317_v23 = vld [vmem:[%s1298_s6 + $0x38] sm:$0xff] }
  0x12   :  { %872 = vmatprep.subr.bf16.mxu0 %v871_v27  ;;  %v908_v20 = vpack.c.bf16 %v315_v17, %v314_v16  ;;  %v334_v24 = vld [vmem:[%s1298_s6 + $0xc0] sm:$0xff]  ;;  %v335_v25 = vld [vmem:[%s1298_s6 + $0xc8] sm:$0xff]  ;;  %v912_v26 = vpack.c.bf16 %v317_v23, %v316_v22  ;;  %v336_v30 = vld [vmem:[%s1298_s6 + $0xd0] sm:$0xff] }
  0x13   :  { %v914_v27 = vpack.c.bf16 %v335_v25, %v334_v24  ;;  %v318_v28 = vld [vmem:[%s1298_s6 + $0x40] sm:$0xff]  ;;  %v319_v29 = vld [vmem:[%s1298_s6 + $0x48] sm:$0xff]  ;;  %v337_v31 = vld [vmem:[%s1298_s6 + $0xd8] sm:$0xff] }
  0x14   :  { %v320_v34 = vld [vmem:[%s1298_s6 + $0x50] sm:$0xff]  ;;  %v321_v35 = vld [vmem:[%s1298_s6 + $0x58] sm:$0xff]  ;;  %v338_v36 = vld [vmem:[%s1298_s6 + $0xe0] sm:$0xff] }
  0x15   :  { %874 = vmatpush1.bf16.msra.mxu0 %v873_v32  ;;  %v916_v32 = vpack.c.bf16 %v319_v29, %v318_v28  ;;  %v339_v37 = vld [vmem:[%s1298_s6 + $0xe8] sm:$0xff]  ;;  %v322_v40 = vld [vmem:[%s1298_s6 + $0x60] sm:$0xff]  ;;  %v340_v42 = vld [vmem:[%s1298_s6 + $0xf0] sm:$0xff] }
  0x16   :  { %876 = vmatprep.subr.bf16.mxu0 %v875_v33  ;;  %v918_v33 = vpack.c.bf16 %v337_v31, %v336_v30  ;;  %v323_v41 = vld [vmem:[%s1298_s6 + $0x68] sm:$0xff]  ;;  %v341_v43 = vld [vmem:[%s1298_s6 + $0xf8] sm:$0xff]  ;;  %v324_v46 = vld [vmem:[%s1298_s6 + $0x70] sm:$0xff] }
  0x17   :  { %v325_v47 = vld [vmem:[%s1298_s6 + $0x78] sm:$0xff]  ;;  %s944_s6 = smov 8   ;;  %v436_v18 = vld [vmem:[%s1303_s9 + $0x8] sm:$0xff]  ;;  %v437_v19 = vld [vmem:[%s1303_s9 + $0x10] sm:$0xff] }
  0x18   :  { %v432_v22 = vld [vmem:[%s1304_s8 + $0x8] sm:$0xff]  ;;  %v433_v23 = vld [vmem:[%s1304_s8 + $0x10] sm:$0xff]  ;;  %v434_v24 = vld [vmem:[%s1304_s8 + $0x18] sm:$0xff] }
  0x19   :  { %878 = vmatpush1.bf16.msra.mxu0 %v877_v38  ;;  %v920_v38 = vpack.c.bf16 %v321_v35, %v320_v34  ;;  %v644_v25 = vld [vmem:[%s1305_s7 + $0x8] sm:$0xff] }
  0x1a   :  { %880 = vmatprep.subr.bf16.mxu0 %v879_v39  ;;  %v922_v39 = vpack.c.bf16 %v339_v37, %v338_v36 }
  0x1d   :  { %882 = vmatpush1.bf16.msra.mxu0 %v881_v44  ;;  %v924_v44 = vpack.c.bf16 %v323_v41, %v322_v40 }
  0x1e   :  { %884 = vmatprep.subr.bf16.mxu0 %v883_v45  ;;  %v926_v45 = vpack.c.bf16 %v341_v43, %v340_v42 }
  0x21   :  { %886 = vmatpush1.bf16.msra.mxu0 %v885_v48  ;;  %v928_v48 = vpack.c.bf16 %v325_v47, %v324_v46 }
  0x24   :  { %134 = vmatmul.mubr.f32.vlgmr.msra.gmra.mrb[0].mxu0 %v35_v49  ;;  %v942_v49 = vmov 0.0|0.0  }
  0x25   :  { %139 = vmatprep.mubr.f32.mxu0 %v941_v3  ;;  %887 = vmatprep.subr.bf16.mxu0 %v942_v49 }
  0x28   :  { %140 = vmatmul.mubr.f32.gmra.mrb[2].mxu0 %v36_v50  ;;  %v147_v50 = vld [vmem:[%s1300_s3] sm:$0xff] }
  0x29   :  { %836 = vmatprep.mubr.msk.f32.mxu0 %vm943_vm1, %v941_v3 }
  0xf7   :  { %v1106_v51 = vpop.f32.mrb[0].mxu0 }
  0xf8   :  { %v1108_v52 = vpop.f32.mrb[1].mxu0  ;;  %v230_v54 = vmul.f32 %v1106_v51, %v1106_v51 }
  0xf9   :  { %v231_v58 = vmul.f32 %v1108_v52, %v1108_v52 }
  0xfb   :  { %v1110_v53 = vpop.f32.mrb[2].mxu0 }
  0xfc   :  { %v232_v55 = vmul.f32 %v1110_v53, %v1110_v53  ;;  %v1116_v56 = vpop.f32.mrb[3].mxu0  ;;  %v892_v57 = vpack.c.bf16 %v1110_v53, %v1106_v51 }
  0xfd   :  { %v233_v59 = vmul.f32 %v1116_v56, %v1116_v56  ;;  %v890_v60 = vpack.c.bf16 %v1116_v56, %v1108_v52 }
  0xfe   :  { %v896_v61 = vpack.c.bf16 %v232_v55, %v230_v54  ;;  %v148_v54 = vld [vmem:[%s1300_s3 + $0x8] sm:$0xff] }
  0xff   :  { %891 = vmatprep.subr.bf16.mxu1 %v890_v60  ;;  %v894_v0 = vpack.c.bf16 %v233_v59, %v231_v58  ;;  %v888_v55 = vpack.c.bf16 %v148_v54, %v147_v50 }
 0x100   :  { %893 = vmatpush1.bf16.msra.mxu1 %v892_v57  ;;  %v146_v57 = vld [vmem:[%s1301_s2] sm:$0x3] }
 0x101   :  { %895 = vmatprep.subr.bf16.mxu1 %v894_v0  ;;  %889 = vmatpush3.bf16.msra.mxu0 %v888_v55 }
 0x104   :  { %897 = vmatpush1.bf16.msra.mxu1 %v896_v61  ;;  %837 = vmatmul.mubr.msk.f32.vlgmr.msra.gmra.mrb[4].mxu0 %vm156_vm2, %v146_v57 }
 0x105   :  { %899 = vmatprep.subr.bf16.mxu1 %v898_v1 }
 0x107   :  { %769 = vmatmul.mubr.msk.f32.vlgmr.msra.gmra.mrb[0].mxu1 %vm235_vm0, %v234_v7 }
 0x108   :  { %901 = vmatpush3.bf16.msra.mxu1 %v900_v8  ;;  %v767_v8 = vld [vmem:[%s1302_s4] ss:$0 sm:$0xff] }
 0x109   :  { %903 = vmatprep.subr.bf16.mxu1 %v902_v9 }
 0x10c   :  { %905 = vmatpush3.bf16.msra.mxu1 %v904_v14  ;;  %v435_v14 = vld [vmem:[%s1303_s9] sm:$0xff] }
 0x10d   :  { %907 = vmatprep.subr.bf16.mxu1 %v906_v15  ;;  %841 = vmatprep.mubr.msk.f32.mxu0 %vm442_vm3, %v435_v14 }
 0x110   :  { %909 = vmatpush3.bf16.msra.mxu1 %v908_v20  ;;  %v438_v20 = vld [vmem:[%s1303_s9 + $0x18] sm:$0xff] }
 0x111   :  { %911 = vmatprep.subr.bf16.mxu1 %v910_v21  ;;  %v431_v21 = vld [vmem:[%s1304_s8] sm:$0xff] }
 0x114   :  { %913 = vmatpush3.bf16.msra.mxu1 %v912_v26  ;;  %v643_v26 = vld [vmem:[%s1305_s7] sm:$0xff] }
 0x115   :  { %915 = vmatprep.subr.bf16.mxu1 %v914_v27 }
 0x118   :  { %917 = vmatpush3.bf16.msra.mxu1 %v916_v32 }
 0x119   :  { %919 = vmatprep.subr.bf16.mxu1 %v918_v33 }
 0x11c   :  { %921 = vmatpush3.bf16.msra.mxu1 %v920_v38 }
 0x11d   :  { %923 = vmatprep.subr.bf16.mxu1 %v922_v39 }
 0x120   :  { %925 = vmatpush3.bf16.msra.mxu1 %v924_v44 }
 0x121   :  { %927 = vmatprep.subr.bf16.mxu1 %v926_v45 }
 0x124   :  { %929 = vmatpush3.bf16.msra.mxu1 %v928_v48 }
 0x125   :  { %658 = vmatprep.subr.mxu1 %v644_v25 }
 0x1d7   :  { %v226_v60 = vpop.f32.mrb[4].mxu0 }
 0x1d8   :  { %v838_v61 = vpop.f32.mrb[5].mxu0  ;;  %v227_v9 = vadd.f32 %v767_v8, %v226_v60 }
 0x1da   :  { %v305_v58 = vpop.f32.mrb[0].mxu1 }
 0x1db   :  { %v307_v59 = vpop.f32.mrb[1].mxu1 }
 0x1dc   :  { %406 = vmatprep.mubr.f32.mxu1 %v307_v59 }
 0x1dd   :  { %407 = vmatmul.mubr.f32.vlgmr.msra.gmra.mrb[2].mxu1 %v305_v58 }
 0x1de   :  { %722 = vmatprep.mubr.f32.mxu1 %v941_v3  ;;  %659 = vmatpush1.msra.mxu1 %v643_v26 }
 0x2b0   :  { %v819_v62 = vpop.f32.mrb[2].mxu1 }
 0x2b1   :  { %v820_v63 = vpop.f32.mrb[3].mxu1 }
 0x2b2   :  { %v821_v0 = vadd.f32 %v820_v63, %v819_v62 }
 0x2b4   :  { %v412_v1 = vmul.f32 0.00390625, %v821_v0 }
 0x2b6   :  { %v413_v2 = vmul.f32 %v412_v1, %v412_v1 }
 0x2b8   :  { %v415_v4 = vrot.slane %v413_v2, 6 }
 0x2ba   :  { %v417_v5 = vsub.f32 %v412_v1, %v415_v4 }
 0x2bc   :  { %v418_v6 = vmax.f32 %v417_v5, 0.0 }
 0x2be   :  { %v419_v7 = vadd.f32 1e-05, %v418_v6 }
 0x2c0   :  { %939 = vrsqrt.f32 %v419_v7 }
 0x2ca   :  { %v940_v10 = vpop.eup %939 }
 0x2cb   :  { %v422_v11 = vrot.slane %v940_v10, 2 }
 0x2cd   :  { %v424_v12 = vmul.f32 %v422_v11, %v227_v9 }
 0x2cf   :  { %v425_v13 = vmul.f32 %v424_v12, %v412_v1 }
 0x2d1   :  { %427 = vrot.lane.b32.xlu0 %v425_v13, %s944_s6 }
 0x343   :  { %v428_v15 = vpop.permute.xlu0 %427 }
 0x344   :  { %v430_v16 = vsub.f32 %v227_v9, %v428_v15 }
 0x346   :  { %440 = vrot.lane.b32.xlu0 %v430_v16, %s945_s24 }
 0x3b8   :  { %v441_v17 = vpop.permute.xlu0 %440 }
 0x3b9   :  { %839 = vmatprep.subr.msk.mxu0 %vm455_vm4, %v441_v17 }
 0x3ba   :  { %840 = vmatpush3.msk.msra.mxu0 %vm455_vm4, %v441_v17 }
 0x3bb   :  { %842 = vmatmul.mubr.msk.f32.vlgmr.msra.gmra.mrb[6].mxu0 %vm442_vm3, %v436_v18  ;;  %847 = vmatprep.subr.msk.mxu0 %vm455_vm4, %v424_v12 }
 0x3bc   :  { %848 = vmatpush3.msk.msra.mxu0 %vm455_vm4, %v424_v12  ;;  %844 = vmatprep.mubr.msk.f32.mxu0 %vm442_vm3, %v437_v19 }
 0x3bf   :  { %845 = vmatmul.mubr.msk.f32.gmra.mrb[8].mxu0 %vm442_vm3, %v438_v20 }
 0x3c0   :  { %849 = vmatprep.mubr.msk.f32.mxu0 %vm442_vm3, %v431_v21 }
 0x3c3   :  { %850 = vmatmul.mubr.msk.f32.vlgmr.msra.gmra.mrb[6].mxu0 %vm442_vm3, %v432_v22 }
 0x3c4   :  { %852 = vmatprep.mubr.msk.f32.mxu0 %vm442_vm3, %v433_v23 }
 0x3c7   :  { %853 = vmatmul.mubr.msk.f32.gmra.mrb[8].mxu0 %vm442_vm3, %v434_v24 }
 0x496   :  { %v851_v27 = vpop.f32.mrb[6].mxu0 }
 0x497   :  { %v624_v28 = vpop.f32.mrb[7].mxu0 }
 0x498   :  { %780 = vmatmul.mubr.msk.f32.vlgmr.msra.gmra.mrb[4].mxu1 %vm645_vm5, %v624_v28 }
 0x499   :  { %728 = vmatprep.mubr.f32.mxu1 %v941_v3 }
 0x49a   :  { %v854_v29 = vpop.f32.mrb[8].mxu0 }
 0x49b   :  { %v634_v30 = vpop.f32.mrb[9].mxu0 }
 0x49c   :  { %781 = vmatmul.mubr.msk.f32.gmra.mrb[6].mxu1 %vm645_vm5, %v851_v27 }
 0x49d   :  { %734 = vmatprep.mubr.f32.mxu1 %v941_v3 }
 0x4a0   :  { %782 = vmatmul.mubr.msk.f32.gmra.mrb[8].mxu1 %vm645_vm5, %v634_v30 }
 0x4a1   :  { %740 = vmatprep.mubr.f32.mxu1 %v941_v3 }
 0x4a4   :  { %783 = vmatmul.mubr.msk.f32.gmra.mrb[10].mxu1 %vm645_vm5, %v854_v29 }
 0x56b   :  { %v724_v31 = vpop.f32.mrb[4].mxu1 }
 0x56c   :  { %v747_v32 = vmul.f32 %v724_v31, %v1106_v51  ;;  %v726_v33 = vpop.f32.mrb[5].mxu1 }
 0x56d   :  { %v748_v34 = vmul.f32 %v726_v33, %v1108_v52 }
 0x56f   :  { %v730_v35 = vpop.f32.mrb[6].mxu1 }
 0x570   :  { %v749_v36 = vmul.f32 %v730_v35, %v1110_v53  ;;  %v732_v37 = vpop.f32.mrb[7].mxu1 }
 0x571   :  { %v750_v38 = vmul.f32 %v732_v37, %v1116_v56 }
 0x573   :  { %v736_v39 = vpop.f32.mrb[8].mxu1 }
 0x574   :  { %v751_v40 = vadd.f32 %v747_v32, %v736_v39  ;;  %v738_v41 = vpop.f32.mrb[9].mxu1 }
 0x575   :  { %v752_v42 = vadd.f32 %v748_v34, %v738_v41 }
 0x576   :  { %v755_v43 = vmax.f32 %v751_v40, 0.0 }
 0x577   :  { %v756_v44 = vmax.f32 %v752_v42, 0.0  ;;  %v742_v3 = vpop.f32.mrb[10].mxu1 }
 0x578   :  { %759 = vst [vmem:[%s1306_s10] sm:$0xff] %v755_v43  ;;  %v753_v51 = vadd.f32 %v749_v36, %v742_v3  ;;  %v744_v45 = vpop.f32.mrb[11].mxu1 }
 0x579   :  { %760 = vst [vmem:[%s1306_s10 + $0x8] sm:$0xff] %v756_v44  ;;  %v754_v52 = vadd.f32 %v750_v38, %v744_v45 }
 0x57a   :  { %v757_v53 = vmax.f32 %v753_v51, 0.0 }
 0x57b   :  { %v758_v56 = vmax.f32 %v754_v52, 0.0 }
 0x57c   :  { %761 = vst [vmem:[%s1306_s10 + $0x10] sm:$0xff] %v757_v53 }
 0x57d   :  { %762 = vst [vmem:[%s1306_s10 + $0x18] sm:$0xff] %v758_v56 }

</bundles_post_ra>
